<compile_context>
chip_gen: v6e
topology: v6e:2x2x1
jax: 0.10.0
libtpu: 0.0.40
codegen_flags: <defaults>
</compile_context>

<pallas_src>
import functools
import math

import jax
import jax.numpy as jnp
from jax.experimental import pallas as pl
from jax.experimental.pallas import tpu as pltpu


def _build_pe_table(max_len: int, d_model: int) -> jnp.ndarray:
    """Sin/cos positional-encoding buffer, shape (max_len, 1, d_model), float32."""
    position = jnp.arange(0, max_len, dtype=jnp.float32)[:, None]               # (L, 1)
    div_term = jnp.exp(
        jnp.arange(0, d_model, 2, dtype=jnp.float32) * (-math.log(10000.0) / d_model)
    )                                                                            # (D//2,)
    pe = jnp.zeros((max_len, d_model), dtype=jnp.float32)
    pe = pe.at[:, 0::2].set(jnp.sin(position * div_term))
    pe = pe.at[:, 1::2].set(jnp.cos(position * div_term))
    return pe[:, None, :]                                                        # (L, 1, D)


def _pos_enc_kernel(x_ref, pe_ref, o_ref, *, scale):
    # x_ref/o_ref: (ts, tb, D); pe_ref: (ts, 1, D) float32.
    # pe broadcasts across the batch (sublane) axis inside the fused add;
    # compute in f32, cast only at the store (mem-bound, casts are free VPU work).
    x = x_ref[...].astype(jnp.float32)
    o_ref[...] = (x * scale + pe_ref[...]).astype(o_ref.dtype)


def _round_up(n: int, m: int) -> int:
    return -(-n // m) * m


def _largest_divisor_leq(n: int, cap: int) -> int:
    cap = max(1, min(int(cap), n))
    for c in range(cap, 0, -1):
        if n % c == 0:
            return c
    return 1


def positional_encoding(x: jnp.ndarray, pe_table: jnp.ndarray, d_model: int,
                        *, seq_tile: int | None = None,
                        batch_tile: int | None = None,
                        target_block_bytes: int = 8 << 20,
                        vmem_budget_bytes: int = 28 << 20,
                        donate_x: bool = False) -> jnp.ndarray:
    """y = x * sqrt(d_model) + pe[:seq_len], as a tiled Pallas TPU kernel.

    x: (seq_len, batch, d_model); pe_table: (max_len, 1, d_model) float32.
    """
    S, B, D = x.shape
    assert D == d_model
    assert S <= pe_table.shape[0], "seq_len exceeds max_len of the pe buffer"
    dtype = x.dtype
    itemsize = jnp.dtype(dtype).itemsize

    # pe slice kept in f32 (PyTorch adds the f32 buffer before any downcast).
    pe = pe_table[:S].astype(jnp.float32)                                        # (S, 1, D)

    # ---- batch tile (sublane dim): full B unless a single seq row overflows the target.
    if batch_tile is not None:
        tb = int(batch_tile)
        assert B % tb == 0 and (tb % 8 == 0 or tb == B), \
            "batch_tile must divide B and be a multiple of 8 (or equal B)"
    else:
        tb = B
        if B * D * itemsize > target_block_bytes and B > 8:
            want = max(8, min(B, target_block_bytes // max(1, D * itemsize)))
            want = (want // 8) * 8
            for cand in range(want, 7, -8):
                if B % cand == 0:
                    tb = cand
                    break

    # ---- seq tile (leading dim: no (8,128) constraint -> any exact divisor of S).
    pad_tb = _round_up(tb, 8)
    pad_d = _round_up(D, 128)
    row_x_vmem = pad_tb * pad_d * itemsize            # one seq row of an x/out block in VMEM
    row_pe_vmem = 8 * pad_d * 4                       # one seq row of the (ts,1,D) f32 pe block
    row_total = 4 * row_x_vmem + 2 * row_pe_vmem      # 2x x + 2x out + 2x pe (double-buffered)
    if seq_tile is not None:
        ts = int(seq_tile)
        assert S % ts == 0, "seq_tile must divide seq_len exactly"
    else:
        ts_cap = min(S,
                     max(1, vmem_budget_bytes // row_total),
                     max(1, target_block_bytes // max(1, tb * D * itemsize)))
        ts = _largest_divisor_leq(S, ts_cap)

    footprint = ts * row_total
    vmem_limit = int(max(footprint + (8 << 20), 32 << 20))   # headroom; << v7x 64 MiB physical

    scale = float(math.sqrt(d_model))
    kernel = functools.partial(_pos_enc_kernel, scale=scale)

    grid = (S // ts, B // tb)   # batch axis innermost -> pe block reused across it
    out = pl.pallas_call(
        kernel,
        out_shape=jax.ShapeDtypeStruct((S, B, D), dtype),
        grid_spec=pltpu.PrefetchScalarGridSpec(
            num_scalar_prefetch=0,
            grid=grid,
            in_specs=[
                pl.BlockSpec((ts, tb, D), lambda i, j: (i, j, 0)),   # x block
                pl.BlockSpec((ts, 1, D), lambda i, j: (i, 0, 0)),    # pe block (j-invariant)
            ],
            out_specs=pl.BlockSpec((ts, tb, D), lambda i, j: (i, j, 0)),
        ),
        compiler_params=pltpu.CompilerParams(
            dimension_semantics=("parallel", "parallel"),
            vmem_limit_bytes=vmem_limit,
        ),
        input_output_aliases=({0: 0} if donate_x else {}),
    )(x, pe)
    return out


def _reference(x, pe_table, d_model):
    scale = math.sqrt(d_model)
    pe = pe_table[: x.shape[0]]                                  # (S, 1, D) f32
    y = x.astype(jnp.float32) * scale + pe
    return y.astype(x.dtype)


if __name__ == "__main__":
    key = jax.random.PRNGKey(0)
    k1, k2, k3, k4 = jax.random.split(key, 4)

    # Case 1: tiny module-convention shapes, single-step grid, D < 128
    # (full-extent lane exception), auto tiling.
    S1, B1, D1, L1 = 8, 2, 32, 64
    x1 = jax.random.normal(k1, (S1, B1, D1), dtype=jnp.float32)
    pe1 = _build_pe_table(L1, D1)
    y1 = jax.block_until_ready(positional_encoding(x1, pe1, D1))
    assert y1.shape == (S1, B1, D1)
    assert jnp.allclose(y1, _reference(x1, pe1, D1), atol=1e-5, rtol=1e-5)

    # Case 2: D multiple of 128, explicit seq tile -> 3-step double-buffered grid.
    S2, B2, D2, L2 = 96, 4, 128, 128
    x2 = jax.random.normal(k2, (S2, B2, D2), dtype=jnp.float32)
    pe2 = _build_pe_table(L2, D2)
    y2 = jax.block_until_ready(positional_encoding(x2, pe2, D2, seq_tile=32))
    assert y2.shape == (S2, B2, D2)
    assert jnp.allclose(y2, _reference(x2, pe2, D2), atol=1e-5, rtol=1e-5)

    # Case 3: bf16 activations, S=50 with a non-multiple-of-8 seq tile (leading
    # block dim has no alignment constraint; no padding / tail pass anywhere).
    S3, B3, D3, L3 = 50, 2, 64, 64
    x3 = jax.random.normal(k3, (S3, B3, D3), dtype=jnp.bfloat16)
    pe3 = _build_pe_table(L3, D3)
    y3 = jax.block_until_ready(positional_encoding(x3, pe3, D3, seq_tile=25))
    assert y3.shape == (S3, B3, D3)
    ref3 = _reference(x3, pe3, D3)
    assert jnp.allclose(y3.astype(jnp.float32), ref3.astype(jnp.float32),
                        atol=1e-2, rtol=1e-2)

    # Case 4: batch-tiled second grid axis (tb=8) with the pe block reused across it.
    S4, B4, D4, L4 = 16, 16, 128, 32
    x4 = jax.random.normal(k4, (S4, B4, D4), dtype=jnp.float32)
    pe4 = _build_pe_table(L4, D4)
    y4 = jax.block_until_ready(
        positional_encoding(x4, pe4, D4, seq_tile=8, batch_tile=8))
    assert y4.shape == (S4, B4, D4)
    assert jnp.allclose(y4, _reference(x4, pe4, D4), atol=1e-5, rtol=1e-5)

    print("KERNEL_OK")
</pallas_src>

<mosaic_0001>
module attributes {stable_mosaic.version = 11 : i64} {
  func.func @_pos_enc_kernel(%arg0: i32, %arg1: i32, %arg2: memref<8x2x32xf32, #tpu.memory_space<vmem>>, %arg3: memref<8x1x32xf32, #tpu.memory_space<vmem>>, %arg4: memref<8x2x32xf32, #tpu.memory_space<vmem>>) attributes {dimension_semantics = [#tpu.dimension_semantics<parallel>, #tpu.dimension_semantics<parallel>], iteration_bounds = array<i64: 1, 1>, scalar_prefetch = 0 : i64, scratch_operands = 0 : i64, tpu.core_type = #tpu.core_type<tc>, window_params = [{transform_indices = @transform_0, window_bounds = array<i64: 8, 2, 32>}, {transform_indices = @transform_1, window_bounds = array<i64: 8, 1, 32>}, {transform_indices = @transform_2, window_bounds = array<i64: 8, 2, 32>}]} {
    %c0 = arith.constant 0 : index
    %c0_0 = arith.constant 0 : index
    %c0_1 = arith.constant 0 : index
    %0 = vector.load %arg2[%c0, %c0_0, %c0_1] : memref<8x2x32xf32, #tpu.memory_space<vmem>>, vector<8x2x32xf32>
    %cst = arith.constant 5.65685415 : f32
    %1 = vector.broadcast %cst : f32 to vector<8x2x32xf32>
    %2 = arith.mulf %0, %1 : vector<8x2x32xf32>
    %c0_2 = arith.constant 0 : index
    %c0_3 = arith.constant 0 : index
    %c0_4 = arith.constant 0 : index
    %3 = vector.load %arg3[%c0_2, %c0_3, %c0_4] : memref<8x1x32xf32, #tpu.memory_space<vmem>>, vector<8x1x32xf32>
    %4 = vector.broadcast %3 : vector<8x1x32xf32> to vector<8x2x32xf32>
    %5 = arith.addf %2, %4 : vector<8x2x32xf32>
    %c0_5 = arith.constant 0 : index
    %c0_6 = arith.constant 0 : index
    %c0_7 = arith.constant 0 : index
    %6 = vector.load %arg4[%c0_5, %c0_6, %c0_7] : memref<8x2x32xf32, #tpu.memory_space<vmem>>, vector<8x2x32xf32>
    tpu.vector_store %arg4[%c0_5, %c0_6, %c0_7], %5 {strides = array<i32>} : memref<8x2x32xf32, #tpu.memory_space<vmem>>, vector<8x2x32xf32>,
    return
  }
  func.func @transform_0(%arg0: i32, %arg1: i32) -> (i32, i32, i32) {
    %c0_i32 = arith.constant 0 : i32
    %c0_i32_0 = arith.constant 0 : i32
    return %arg0, %arg1, %c0_i32 : i32, i32, i32
  }
  func.func @transform_1(%arg0: i32, %arg1: i32) -> (i32, i32, i32) {
    %c0_i32 = arith.constant 0 : i32
    %c0_i32_0 = arith.constant 0 : i32
    %c0_i32_1 = arith.constant 0 : i32
    return %arg0, %c0_i32, %c0_i32_0 : i32, i32, i32
  }
  func.func @transform_2(%arg0: i32, %arg1: i32) -> (i32, i32, i32) {
    %c0_i32 = arith.constant 0 : i32
    %c0_i32_0 = arith.constant 0 : i32
    return %arg0, %arg1, %c0_i32 : i32, i32, i32
  }
}

</mosaic_0001>

<bundles_post_ra>
// kernel: tpu_custom_call.1
= control target key start
LH: loop header
LB: loop body
LE: loop exit
PB: predicated region body
PF: predicated region fallthrough
CT: control target
= control target key end

     0   :  { %7 = vsyncpa [#allocation3], 0  ;;  %s276_s0 = inlined_call_operand.hbm [shape: f32[8,2,32], index: 0, kind: input, shape index: {}]   ;;  %s277_s1 = inlined_call_operand.hbm [shape: f32[8,1,32], index: 1, kind: input, shape index: {}]   ;;  %s278_s2 = inlined_call_operand.hbm [shape: f32[8,2,32], index: 2, kind: output, shape index: {}]  }
   0x1   :  { %8 = vsyncpa [#allocation6], 0 }
   0x2   :  { %9 = vsyncpa [#allocation4], 0  ;;  %s228_s9 = smov [#allocation2]  }
   0x3   :  { %s15_s10 = sshll.u32 %s228_s9, 4  ;;  %s16_s10 = int_to_ptr.vmem [resolvable:$true] %s15_s10 }
   0x4   :  { %s170_s11 = scalar_lea.vmem %s16_s10, 256  ;;  %p175_p1 = scmp.lt.s32.totalorder %s16_s10, %s16_s10 }
   0x5   :  { %p171_p0 = scmp.ne.s32.totalorder %s16_s10, %s170_s11  ;;  %p176_p2 = scmp.lt.s32.totalorder %s170_s11, %s170_s11 }
   0x7   :  { %p177_p3 = por %p176_p2, %p175_p1 }
   0x9   :  { %p178_p4 = pnand %p177_p3, %p171_p0 }
   0xb   :  { %181 = shalt.err (!%p178_p4)
}
   0xc   :  { %s229_s12 = smov 32   ;;  %s230_s13 = smov 2  }
   0xd   :  { %21 = dma.hbm_to_vmem [thread:$0]  %s276_s0, 256, %s16_s10, [#allocation3], %s229_s12, %s229_s12, %s230_s13  }
   0xe   :  { %s231_s16 = smov [#allocation5]  }
   0xf   :  { %s27_s17 = sshll.u32 %s231_s16, 4  ;;  %s28_s17 = int_to_ptr.vmem [resolvable:$true] %s27_s17 }
  0x10   :  { %s190_s18 = scalar_lea.vmem %s28_s17, 128  ;;  %p195_p6 = scmp.lt.s32.totalorder %s28_s17, %s28_s17 }
  0x11   :  { %p191_p5 = scmp.ne.s32.totalorder %s28_s17, %s190_s18  ;;  %p196_p7 = scmp.lt.s32.totalorder %s190_s18, %s190_s18 }
  0x13   :  { %p197_p8 = por %p196_p7, %p195_p6 }
  0x15   :  { %p198_p9 = pnand %p197_p8, %p191_p5 }
  0x17   :  { %201 = shalt.err (!%p198_p9)
}
  0x18   :  { %s232_s19 = smov 16   ;;  %s233_s20 = smov 1  }
  0x19   :  { %33 = dma.hbm_to_vmem [thread:$0]  %s277_s1, 128, %s28_s17, [#allocation6], %s232_s19, %s232_s19, %s233_s20  }
  0x1a   :  { %222 = dma.done.wait [#allocation3], 256  }
  0x1b   :  { %223 = vsyncadd [#allocation3], 4294967040 }
  0x1c   :  { %224 = dma.done.wait [#allocation6], 128  }
  0x1d   :  { %225 = vsyncadd [#allocation6], 4294967168  ;;  %vm120_vm0 = vcmask 254976   ;;  %s234_s0 = smov [#allocation7]   ;;  %v40_v0 = vld [vmem:[#allocation2] sm:$0x3] }
  0x1e   :  { %s259_s23 = sshll.u32 %s234_s0, 4  ;;  %v147_v1 = vld [vmem:[#allocation5] ss:$0 sm:$0xff]  ;;  %v41_v2 = vld [vmem:[#allocation2 + $0x2] sm:$0x3]  ;;  %s135_s23 = int_to_ptr.vmem [resolvable:$true] %s259_s23 }
  0x1f   :  { %v48_v3 = vmul.f32 5.656854, %v40_v0  ;;  %v49_v4 = vmul.f32 5.656854, %v41_v2  ;;  %v148_v5 = vld [vmem:[#allocation5 + $0x1] ss:$0 sm:$0xff]  ;;  %p207_p11 = scmp.lt.s32.totalorder %s135_s23, %s135_s23 }
  0x20   :  { %v42_v6 = vld [vmem:[#allocation2 + $0x4] sm:$0x3]  ;;  %v149_v7 = vld [vmem:[#allocation5 + $0x2] ss:$0 sm:$0xff]  ;;  %v43_v8 = vld [vmem:[#allocation2 + $0x6] sm:$0x3] }
  0x21   :  { %v112_v9 = vadd.f32 %v147_v1, %v48_v3  ;;  %v113_v10 = vadd.f32 %v148_v5, %v49_v4  ;;  %v50_v11 = vmul.f32 5.656854, %v42_v6  ;;  %v51_v12 = vmul.f32 5.656854, %v43_v8  ;;  %v150_v13 = vld [vmem:[#allocation5 + $0x3] ss:$0 sm:$0xff] }
  0x22   :  { %v44_v14 = vld [vmem:[#allocation2 + $0x8] sm:$0x3]  ;;  %v151_v15 = vld [vmem:[#allocation5 + $0x4] ss:$0 sm:$0xff]  ;;  %v45_v16 = vld [vmem:[#allocation2 + $0xa] sm:$0x3] }
  0x23   :  { %121 = vst.msk [vmem:[#allocation7] sm:$0x3] %vm120_vm0, %v112_v9  ;;  %122 = vst.msk [vmem:[#allocation7 + $0x2] sm:$0x3] %vm120_vm0, %v113_v10  ;;  %v114_v17 = vadd.f32 %v149_v7, %v50_v11  ;;  %v115_v18 = vadd.f32 %v150_v13, %v51_v12  ;;  %v52_v19 = vmul.f32 5.656854, %v44_v14 }
  0x24   :  { %v53_v20 = vmul.f32 5.656854, %v45_v16  ;;  %v152_v21 = vld [vmem:[#allocation5 + $0x5] ss:$0 sm:$0xff]  ;;  %v46_v22 = vld [vmem:[#allocation2 + $0xc] sm:$0x3] }
  0x25   :  { %v153_v23 = vld [vmem:[#allocation5 + $0x6] ss:$0 sm:$0xff]  ;;  %v47_v24 = vld [vmem:[#allocation2 + $0xe] sm:$0x3]  ;;  %123 = vst.msk [vmem:[#allocation7 + $0x4] sm:$0x3] %vm120_vm0, %v114_v17  ;;  %v116_v25 = vadd.f32 %v151_v15, %v52_v19 }
  0x26   :  { %124 = vst.msk [vmem:[#allocation7 + $0x6] sm:$0x3] %vm120_vm0, %v115_v18  ;;  %v117_v26 = vadd.f32 %v152_v21, %v53_v20  ;;  %v54_v27 = vmul.f32 5.656854, %v46_v22  ;;  %v55_v28 = vmul.f32 5.656854, %v47_v24 }
  0x27   :  { %v154_v29 = vld [vmem:[#allocation5 + $0x7] ss:$0 sm:$0xff]  ;;  %125 = vst.msk [vmem:[#allocation7 + $0x8] sm:$0x3] %vm120_vm0, %v116_v25  ;;  %s202_s1 = scalar_lea.vmem %s135_s23, 256 }
  0x28   :  { %126 = vst.msk [vmem:[#allocation7 + $0xa] sm:$0x3] %vm120_vm0, %v117_v26  ;;  %v118_v30 = vadd.f32 %v153_v23, %v54_v27  ;;  %v119_v31 = vadd.f32 %v154_v29, %v55_v28  ;;  %p203_p10 = scmp.ne.s32.totalorder %s135_s23, %s202_s1  ;;  %p208_p12 = scmp.lt.s32.totalorder %s202_s1, %s202_s1 }
  0x2a   :  { %127 = vst.msk [vmem:[#allocation7 + $0xc] sm:$0x3] %vm120_vm0, %v118_v30  ;;  %128 = vst.msk [vmem:[#allocation7 + $0xe] sm:$0x3] %vm120_vm0, %v119_v31  ;;  %p209_p13 = por %p208_p12, %p207_p11 }
  0x2c   :  { %p210_p0 = pnand %p209_p13, %p203_p10 }
  0x2e   :  { %213 = shalt.err (!%p210_p0)
}
  0x2f   :  { %140 = dma.vmem_to_hbm [thread:$0]  %s135_s23, 256, %s278_s2, [#allocation4], %s229_s12, %s229_s12, %s230_s13  }
  0x30   :  { %226 = dma.done.wait [#allocation4], 256  }
  0x31   :  { %227 = vsyncadd [#allocation4], 4294967040 }
  0x32   :  { %144 = vsyncpa [#allocation3], 1 }
  0x33   :  { %145 = vsyncpa [#allocation6], 1 }
  0x34   :  { %146 = vsyncpa [#allocation4], 1 }

</bundles_post_ra>
